<compile_context>
chip_gen: v5e
topology: v5e:2x2
jax: 0.10.0
libtpu: 0.0.40
codegen_flags: <defaults>
</compile_context>

<pallas_src>
import functools

import jax
import jax.numpy as jnp
from jax.experimental import pallas as pl
from jax.experimental.pallas import tpu as pltpu


_LANE_CANDIDATES = (1024, 512, 256, 128)   # lane-dense last dims (multiples of 128)


def _scalar_mul_kernel(scalar_ref, x_ref, o_ref):
    # scalar_ref: f32[1] in SMEM; x_ref / o_ref: (block_rows, lanes) in VMEM.
    if jnp.issubdtype(x_ref.dtype, jnp.floating):
        # Multiply in the input dtype (matches PyTorch promotion for a 0-d
        # same-category scalar parameter); no convert/pack ops, no final cast.
        o_ref[...] = x_ref[...] * scalar_ref[0].astype(x_ref.dtype)
    else:
        # TODO(synk): integer inputs -- PyTorch would promote to float; we compute
        # in f32 and cast back to keep the wrapper dtype-preserving.
        o_ref[...] = (x_ref[...].astype(jnp.float32) * scalar_ref[0]).astype(o_ref.dtype)


def _rup(x, m):
    return (x + m - 1) // m * m


@functools.lru_cache(maxsize=None)
def _tile_budget_and_min_grid():
    """(per-tile byte budget, minimum grid steps) for the local TPU generation."""
    try:
        kind = jax.devices()[0].device_kind.lower()
    except Exception:  # pragma: no cover - no devices / CPU fallback
        kind = ""
    if "v7" in kind:
        # 64 MiB physical / 32 MiB default scoped VMEM; 2 TensorCores -> shard.
        return 4 * 1024 * 1024, 2
    if "v6" in kind or "v4" in kind or "v5p" in kind:
        return 4 * 1024 * 1024, 1
    if "v5" in kind:
        # v5e: 16 MiB default scoped VMEM -> keep double-buffered in+out <= 8 MiB.
        return 2 * 1024 * 1024, 1
    return 2 * 1024 * 1024, 1   # unknown: conservative


def _choose_block_rows(rows, lanes, itemsize):
    budget, min_grid = _tile_budget_and_min_grid()
    # Sublane packing: 8 rows f32, 16 bf16, 32 int8/fp8.
    sub_align = max(8, 32 // max(itemsize, 1))
    max_rows = max(budget // (lanes * itemsize), sub_align)
    max_rows = max_rows // sub_align * sub_align
    want = _rup(pl.cdiv(rows, min_grid), sub_align)   # >= min_grid steps (v7x)
    block_rows = min(max_rows, want)
    if block_rows >= rows:
        return rows          # single full-extent block (no alignment constraint)
    return block_rows        # multiple of sub_align; partial last block is masked


@functools.lru_cache(maxsize=None)
def _get_scalar_mul_call(rows, lanes, block_rows, dtype_name, donate):
    dtype = jnp.dtype(dtype_name)
    extra = {"input_output_aliases": {1: 0}} if donate else {}
    return pl.pallas_call(
        _scalar_mul_kernel,
        out_shape=jax.ShapeDtypeStruct((rows, lanes), dtype),
        grid=(pl.cdiv(rows, block_rows),),
        in_specs=[
            pl.BlockSpec(memory_space=pltpu.MemorySpace.SMEM),      # scalar (1 word)
            pl.BlockSpec((block_rows, lanes), lambda i: (i, 0)),    # x tile
        ],
        out_specs=pl.BlockSpec((block_rows, lanes), lambda i: (i, 0)),
        compiler_params=pltpu.CompilerParams(
            dimension_semantics=("parallel",)),
        **extra,
    )


def scalar_multiply(x, scalar, *, donate=True):
    """Pallas equivalent of ScalarMultiply.forward: x * scalar (any shape)."""
    orig_shape = x.shape
    dtype = x.dtype
    n = x.size
    if n == 0:
        return x

    flat = jnp.reshape(x, (-1,))

    # Fast path: pick the widest lane-dense width that divides n -> no pad, no slice.
    lanes = next((l for l in _LANE_CANDIDATES if n % l == 0), None)
    ragged = lanes is None
    if ragged:
        # Rare for NFNet activations; minimal pad to one 128-lane multiple.
        lanes = 128
        padded_n = _rup(n, lanes)
        flat = jnp.pad(flat, (0, padded_n - n))
    else:
        padded_n = n

    rows = padded_n // lanes
    x2 = flat.reshape(rows, lanes)
    s = jnp.asarray(scalar, jnp.float32).reshape(1)        # one SMEM word

    block_rows = _choose_block_rows(rows, lanes, dtype.itemsize)
    call = _get_scalar_mul_call(rows, lanes, block_rows, str(dtype), bool(donate))
    out = call(s, x2)

    if ragged:
        out = out.reshape(-1)[:n]
    return out.reshape(orig_shape)


# ----------------------------------------------------------------------------
if __name__ == "__main__":
    key = jax.random.PRNGKey(0)
    k1, k2, k3, k4 = jax.random.split(key, 4)

    mult = jax.jit(scalar_multiply)
    scalar = jnp.float32(1.5)   # NFNet skip_gain initializes this to 0.0; 1.5 keeps the check non-trivial

    # (1) Small NFNet-like activation (B, C, F, T): fast path, single block.
    x = jax.random.normal(k1, (2, 4, 16, 16), jnp.float32)
    out = jax.block_until_ready(mult(x, scalar))
    assert out.shape == x.shape and out.dtype == x.dtype
    assert bool(jnp.allclose(out, x * scalar, rtol=1e-6, atol=0.0))

    # (2) Larger activation: no-pad fast path with a multi-step grid.
    x_big = jax.random.normal(k2, (16, 128, 32, 32), jnp.float32)
    out_big = jax.block_until_ready(mult(x_big, scalar))
    assert out_big.shape == x_big.shape
    assert bool(jnp.allclose(out_big, x_big * scalar, rtol=1e-6, atol=0.0))

    # (3) bf16 input: multiply runs in bf16 (scalar cast in-kernel), output stays bf16.
    x_bf16 = jax.random.normal(k3, (2, 4, 16, 16), jnp.float32).astype(jnp.bfloat16)
    out_bf16 = jax.block_until_ready(mult(x_bf16, scalar))
    ref_bf16 = x_bf16 * scalar.astype(jnp.bfloat16)
    assert out_bf16.dtype == jnp.bfloat16
    assert bool(jnp.allclose(out_bf16.astype(jnp.float32),
                             ref_bf16.astype(jnp.float32), rtol=1e-2, atol=1e-2))

    # (4) Ragged element count: pad+slice fallback path.
    x_rag = jax.random.normal(k4, (3, 5, 7), jnp.float32)
    out_rag = jax.block_until_ready(mult(x_rag, scalar))
    assert out_rag.shape == x_rag.shape
    assert bool(jnp.allclose(out_rag, x_rag * scalar, rtol=1e-6, atol=0.0))

    for o in (out, out_big, out_bf16.astype(jnp.float32), out_rag):
        assert bool(jnp.all(jnp.isfinite(o)))

    print("KERNEL_OK")
</pallas_src>

<mosaic_0001>
module attributes {stable_mosaic.version = 11 : i64} {
  func.func @_scalar_mul_kernel(%arg0: i32, %arg1: memref<1xf32, #tpu.memory_space<smem>>, %arg2: memref<2x1024xf32, #tpu.memory_space<vmem>>, %arg3: memref<2x1024xf32, #tpu.memory_space<vmem>>) attributes {dimension_semantics = [#tpu.dimension_semantics<parallel>], iteration_bounds = array<i64: 1>, scalar_prefetch = 0 : i64, scratch_operands = 0 : i64, tpu.core_type = #tpu.core_type<tc>, window_params = [{transform_indices = @transform_0, window_bounds = array<i64: 1>}, {transform_indices = @transform_1, window_bounds = array<i64: 2, 1024>}, {transform_indices = @transform_2, window_bounds = array<i64: 2, 1024>}]} {
    %c0 = arith.constant 0 : index
    %c0_0 = arith.constant 0 : index
    %0 = vector.load %arg2[%c0, %c0_0] : memref<2x1024xf32, #tpu.memory_space<vmem>>, vector<2x1024xf32>
    %c0_1 = arith.constant 0 : index
    %1 = memref.load %arg1[%c0_1] : memref<1xf32, #tpu.memory_space<smem>>
    %2 = vector.broadcast %1 : f32 to vector<2x1024xf32>
    %3 = arith.mulf %0, %2 : vector<2x1024xf32>
    %c0_2 = arith.constant 0 : index
    %c0_3 = arith.constant 0 : index
    %4 = vector.load %arg3[%c0_2, %c0_3] : memref<2x1024xf32, #tpu.memory_space<vmem>>, vector<2x1024xf32>
    tpu.vector_store %arg3[%c0_2, %c0_3], %3 {strides = array<i32>} : memref<2x1024xf32, #tpu.memory_space<vmem>>, vector<2x1024xf32>,
    return
  }
  func.func @transform_0(%arg0: i32) -> i32 {
    %c0_i32 = arith.constant 0 : i32
    %c0_i32_0 = arith.constant 0 : i32
    return %c0_i32 : i32
  }
  func.func @transform_1(%arg0: i32) -> (i32, i32) {
    %c0_i32 = arith.constant 0 : i32
    %c0_i32_0 = arith.constant 0 : i32
    return %arg0, %c0_i32 : i32, i32
  }
  func.func @transform_2(%arg0: i32) -> (i32, i32) {
    %c0_i32 = arith.constant 0 : i32
    %c0_i32_0 = arith.constant 0 : i32
    return %arg0, %c0_i32 : i32, i32
  }
}

</mosaic_0001>

<bundles_post_ra>
// kernel: scalar_multiply.1
= control target key start
LH: loop header
LB: loop body
LE: loop exit
PB: predicated region body
PF: predicated region fallthrough
CT: control target
= control target key end

     0   :  { %s54_s0 = inlined_call_operand.<no memory space> [shape: f32[1], index: 0, kind: input, shape index: {}]   ;;  %s55_s1 = inlined_call_operand.vmem [shape: f32[2,1024], index: 1, kind: input, shape index: {}, may-alias: {1,2}]   ;;  %s56_s2 = inlined_call_operand.vmem [shape: f32[2,1024], index: 2, kind: output, shape index: {}, may-alias: {1,2}]  }
   0x1   :  { %v12_v0 = vld [vmem:[%s55_s1] sm:$0xff]  ;;  %v15_v1 = vstv %s54_s0  ;;  %v13_v2 = vld [vmem:[%s55_s1 + $0x8] sm:$0xff] }
   0x2   :  { %v16_v3 = vmul.f32 %v15_v1, %v12_v0  ;;  %v17_v4 = vmul.f32 %v15_v1, %v13_v2 }
   0x4   :  { %18 = vst [vmem:[%s56_s2] sm:$0xff] %v16_v3 }
   0x5   :  { %19 = vst [vmem:[%s56_s2 + $0x8] sm:$0xff] %v17_v4 }

</bundles_post_ra>
